<compile_context>
chip_gen: v6e
topology: v6e:2x2x1
jax: 0.10.0
libtpu: 0.0.40
codegen_flags: <defaults>
</compile_context>

<pallas_src>
import jax
import jax.numpy as jnp
from jax.experimental import pallas as pl
from jax.experimental.pallas import tpu as pltpu


def mlp_kernel(x_ref, w1_ref, b1_ref, w2_ref, b2_ref, w3_ref, b3_ref, o_ref):
    bf = jnp.bfloat16
    # Layer 1: Linear (bf16 MXU operands, f32 accumulate) + ReLU in f32.
    h = jnp.dot(x_ref[...].astype(bf), w1_ref[...].astype(bf),
                preferred_element_type=jnp.float32)
    h = jnp.maximum(h + b1_ref[...], 0.0)
    # Layer 2: Linear + ReLU.
    h = jnp.dot(h.astype(bf), w2_ref[...].astype(bf),
                preferred_element_type=jnp.float32)
    h = jnp.maximum(h + b2_ref[...], 0.0)
    # Layer 3: output head (no activation). Output block last dim == n_out.
    o = jnp.dot(h.astype(bf), w3_ref[...].astype(bf),
                preferred_element_type=jnp.float32)
    o_ref[...] = (o + b3_ref[...]).astype(o_ref.dtype)


def _round_up(a, m):
    return (a + m - 1) // m * m


def mymodel_forward(x, w1, b1, w2, b2, w3, b3, *, tile_b=512):
    """x: [B, n_in] f32. Weights [in, out], biases [1, out], all f32.

    Returns [B, n_out] f32. Matmuls run in bf16 with f32 accumulation on the
    MXU; all casts happen inside the kernel (no wrapper-side HBM passes).
    """
    B, n_in = x.shape
    h0 = w1.shape[1]
    h1 = w2.shape[1]
    n_out = w3.shape[1]

    # Clamp the batch tile for small batches (multiple of 8 for sublane
    # tiling); keep the default 512 for large batches so e.g. B=1024 gives an
    # even 2-step grid (both v7x TensorCores busy; no-op on v5e/v6e).
    tile_b = max(8, min(tile_b, _round_up(B, 8)))
    grid = (pl.cdiv(B, tile_b),)

    # Weights / biases: one full block, reused (VMEM-resident) every grid step.
    def resident(a):
        return pl.BlockSpec(a.shape, lambda i: (0,) * a.ndim)

    # Bandwidth/overhead-bound: tell XLA so (near-zero flops, bytes dominate).
    flops = 2 * B * (n_in * h0 + h0 * h1 + h1 * n_out)
    bytes_accessed = (x.size + w1.size + b1.size + w2.size + b2.size
                      + w3.size + b3.size + B * n_out) * 4
    cost = pl.CostEstimate(flops=flops, transcendentals=0,
                           bytes_accessed=bytes_accessed)

    out = pl.pallas_call(
        mlp_kernel,
        out_shape=jax.ShapeDtypeStruct((B, n_out), jnp.float32),
        grid=grid,
        in_specs=[
            pl.BlockSpec((tile_b, n_in), lambda i: (i, 0)),   # x: streamed
            resident(w1), resident(b1),
            resident(w2), resident(b2),
            resident(w3), resident(b3),
        ],
        out_specs=pl.BlockSpec((tile_b, n_out), lambda i: (i, 0)),
        compiler_params=pltpu.CompilerParams(
            dimension_semantics=("parallel",),   # split batch tiles across TCs
        ),
        cost_estimate=cost,
    )(x, w1, b1, w2, b2, w3, b3)

    return out


def init_linear(key, fan_in, fan_out):
    """Deterministic init mimicking torch.nn.Linear (uniform(+/- 1/sqrt(fan_in)))."""
    kw, kb = jax.random.split(key)
    bound = 1.0 / jnp.sqrt(jnp.float32(fan_in))
    # Stored as [in, out] so the kernel does x @ W directly (== PyTorch x @ W.T).
    w = jax.random.uniform(kw, (fan_in, fan_out), jnp.float32, -bound, bound)
    b = jax.random.uniform(kb, (1, fan_out), jnp.float32, -bound, bound)
    return w, b


def reference_forward(x, w1, b1, w2, b2, w3, b3):
    """Same numerics as the kernel: bf16 matmul operands, f32 accumulate."""
    bf = jnp.bfloat16
    h = jnp.dot(x.astype(bf), w1.astype(bf), preferred_element_type=jnp.float32)
    h = jnp.maximum(h + b1, 0.0)
    h = jnp.dot(h.astype(bf), w2.astype(bf), preferred_element_type=jnp.float32)
    h = jnp.maximum(h + b2, 0.0)
    o = jnp.dot(h.astype(bf), w3.astype(bf), preferred_element_type=jnp.float32)
    return o + b3


if __name__ == "__main__":
    # Small shapes consistent with MyModel(n_input, n_output, nn.ReLU) and
    # wandb.config.n_hidden_unit_list == [32, 32].
    B, n_input, n_h0, n_h1, n_output = 8, 16, 32, 32, 8

    key = jax.random.PRNGKey(0)
    kx, k1, k2, k3 = jax.random.split(key, 4)

    x = jax.random.normal(kx, (B, n_input), jnp.float32)
    w1, b1 = init_linear(k1, n_input, n_h0)
    w2, b2 = init_linear(k2, n_h0, n_h1)
    w3, b3 = init_linear(k3, n_h1, n_output)

    # Small-batch check: tile_b clamps to 8, single grid step, no padding rows.
    out = jax.block_until_ready(mymodel_forward(x, w1, b1, w2, b2, w3, b3))
    ref = reference_forward(x, w1, b1, w2, b2, w3, b3)
    assert out.shape == (B, n_output)
    assert jnp.allclose(out, ref, atol=1e-3, rtol=1e-3), "small-batch mismatch"

    # Larger batch exercising the batch grid (2 steps) and a ragged last tile.
    B_big = 1000
    x_big = jax.random.normal(jax.random.PRNGKey(1), (B_big, n_input), jnp.float32)
    out_big = jax.block_until_ready(
        mymodel_forward(x_big, w1, b1, w2, b2, w3, b3))
    ref_big = reference_forward(x_big, w1, b1, w2, b2, w3, b3)
    assert out_big.shape == (B_big, n_output)
    assert jnp.allclose(out_big, ref_big, atol=1e-3, rtol=1e-3), "big-batch mismatch"

    print("KERNEL_OK")
</pallas_src>

<mosaic_0001>
module attributes {stable_mosaic.version = 11 : i64} {
  func.func @mlp_kernel(%arg0: i32, %arg1: memref<8x16xf32, #tpu.memory_space<vmem>>, %arg2: memref<16x32xf32, #tpu.memory_space<vmem>>, %arg3: memref<1x32xf32, #tpu.memory_space<vmem>>, %arg4: memref<32x32xf32, #tpu.memory_space<vmem>>, %arg5: memref<1x32xf32, #tpu.memory_space<vmem>>, %arg6: memref<32x8xf32, #tpu.memory_space<vmem>>, %arg7: memref<1x8xf32, #tpu.memory_space<vmem>>, %arg8: memref<8x8xf32, #tpu.memory_space<vmem>>) attributes {dimension_semantics = [#tpu.dimension_semantics<parallel>], iteration_bounds = array<i64: 1>, scalar_prefetch = 0 : i64, scratch_operands = 0 : i64, tpu.core_type = #tpu.core_type<tc>, window_params = [{transform_indices = @transform_0, window_bounds = array<i64: 8, 16>}, {pipeline_mode = #tpu.pipeline_mode<synchronous>, transform_indices = @transform_1, window_bounds = array<i64: 16, 32>}, {pipeline_mode = #tpu.pipeline_mode<synchronous>, transform_indices = @transform_2, window_bounds = array<i64: 1, 32>}, {pipeline_mode = #tpu.pipeline_mode<synchronous>, transform_indices = @transform_3, window_bounds = array<i64: 32, 32>}, {pipeline_mode = #tpu.pipeline_mode<synchronous>, transform_indices = @transform_4, window_bounds = array<i64: 1, 32>}, {pipeline_mode = #tpu.pipeline_mode<synchronous>, transform_indices = @transform_5, window_bounds = array<i64: 32, 8>}, {pipeline_mode = #tpu.pipeline_mode<synchronous>, transform_indices = @transform_6, window_bounds = array<i64: 1, 8>}, {transform_indices = @transform_7, window_bounds = array<i64: 8, 8>}]} {
    %c0 = arith.constant 0 : index
    %c0_0 = arith.constant 0 : index
    %0 = vector.load %arg1[%c0, %c0_0] : memref<8x16xf32, #tpu.memory_space<vmem>>, vector<8x16xf32>
    %1 = arith.truncf %0 : vector<8x16xf32> to vector<8x16xbf16>
    %c0_1 = arith.constant 0 : index
    %c0_2 = arith.constant 0 : index
    %2 = vector.load %arg2[%c0_1, %c0_2] : memref<16x32xf32, #tpu.memory_space<vmem>>, vector<16x32xf32>
    %3 = arith.truncf %2 : vector<16x32xf32> to vector<16x32xbf16>
    %cst = arith.constant dense<0.000000e+00> : vector<8x32xf32>
    %4 = tpu.matmul %1, %3, %cst {dimension_numbers = #tpu.dot_dimension_numbers<[1], [0], [0], [1], [0, 0, 1, 1], [], []>} : vector<8x16xbf16>, vector<16x32xbf16>, vector<8x32xf32> -> vector<8x32xf32>
    %c0_3 = arith.constant 0 : index
    %c0_4 = arith.constant 0 : index
    %5 = vector.load %arg3[%c0_3, %c0_4] : memref<1x32xf32, #tpu.memory_space<vmem>>, vector<1x32xf32>
    %6 = vector.broadcast %5 : vector<1x32xf32> to vector<8x32xf32>
    %7 = arith.addf %4, %6 : vector<8x32xf32>
    %cst_5 = arith.constant 0.000000e+00 : f32
    %8 = vector.broadcast %cst_5 : f32 to vector<8x32xf32>
    %9 = arith.maximumf %7, %8 : vector<8x32xf32>
    %10 = arith.truncf %9 : vector<8x32xf32> to vector<8x32xbf16>
    %c0_6 = arith.constant 0 : index
    %c0_7 = arith.constant 0 : index
    %11 = vector.load %arg4[%c0_6, %c0_7] : memref<32x32xf32, #tpu.memory_space<vmem>>, vector<32x32xf32>
    %12 = arith.truncf %11 : vector<32x32xf32> to vector<32x32xbf16>
    %cst_8 = arith.constant dense<0.000000e+00> : vector<8x32xf32>
    %13 = tpu.matmul %10, %12, %cst_8 {dimension_numbers = #tpu.dot_dimension_numbers<[1], [0], [0], [1], [0, 0, 1, 1], [], []>} : vector<8x32xbf16>, vector<32x32xbf16>, vector<8x32xf32> -> vector<8x32xf32>
    %c0_9 = arith.constant 0 : index
    %c0_10 = arith.constant 0 : index
    %14 = vector.load %arg5[%c0_9, %c0_10] : memref<1x32xf32, #tpu.memory_space<vmem>>, vector<1x32xf32>
    %15 = vector.broadcast %14 : vector<1x32xf32> to vector<8x32xf32>
    %16 = arith.addf %13, %15 : vector<8x32xf32>
    %cst_11 = arith.constant 0.000000e+00 : f32
    %17 = vector.broadcast %cst_11 : f32 to vector<8x32xf32>
    %18 = arith.maximumf %16, %17 : vector<8x32xf32>
    %19 = arith.truncf %18 : vector<8x32xf32> to vector<8x32xbf16>
    %c0_12 = arith.constant 0 : index
    %c0_13 = arith.constant 0 : index
    %20 = vector.load %arg6[%c0_12, %c0_13] : memref<32x8xf32, #tpu.memory_space<vmem>>, vector<32x8xf32>
    %21 = arith.truncf %20 : vector<32x8xf32> to vector<32x8xbf16>
    %cst_14 = arith.constant dense<0.000000e+00> : vector<8x8xf32>
    %22 = tpu.matmul %19, %21, %cst_14 {dimension_numbers = #tpu.dot_dimension_numbers<[1], [0], [0], [1], [0, 0, 1, 1], [], []>} : vector<8x32xbf16>, vector<32x8xbf16>, vector<8x8xf32> -> vector<8x8xf32>
    %c0_15 = arith.constant 0 : index
    %c0_16 = arith.constant 0 : index
    %23 = vector.load %arg7[%c0_15, %c0_16] : memref<1x8xf32, #tpu.memory_space<vmem>>, vector<1x8xf32>
    %24 = vector.broadcast %23 : vector<1x8xf32> to vector<8x8xf32>
    %25 = arith.addf %22, %24 : vector<8x8xf32>
    %c0_17 = arith.constant 0 : index
    %c0_18 = arith.constant 0 : index
    %26 = vector.load %arg8[%c0_17, %c0_18] : memref<8x8xf32, #tpu.memory_space<vmem>>, vector<8x8xf32>
    tpu.vector_store %arg8[%c0_17, %c0_18], %25 {strides = array<i32>} : memref<8x8xf32, #tpu.memory_space<vmem>>, vector<8x8xf32>,
    return
  }
  func.func @transform_0(%arg0: i32) -> (i32, i32) {
    %c0_i32 = arith.constant 0 : i32
    %c0_i32_0 = arith.constant 0 : i32
    return %arg0, %c0_i32 : i32, i32
  }
  func.func @transform_1(%arg0: i32) -> (i32, i32) {
    %c0_i32 = arith.constant 0 : i32
    %c0_i32_0 = arith.constant 0 : i32
    %c0_i32_1 = arith.constant 0 : i32
    return %c0_i32, %c0_i32_0 : i32, i32
  }
  func.func @transform_2(%arg0: i32) -> (i32, i32) {
    %c0_i32 = arith.constant 0 : i32
    %c0_i32_0 = arith.constant 0 : i32
    %c0_i32_1 = arith.constant 0 : i32
    return %c0_i32, %c0_i32_0 : i32, i32
  }
  func.func @transform_3(%arg0: i32) -> (i32, i32) {
    %c0_i32 = arith.constant 0 : i32
    %c0_i32_0 = arith.constant 0 : i32
    %c0_i32_1 = arith.constant 0 : i32
    return %c0_i32, %c0_i32_0 : i32, i32
  }
  func.func @transform_4(%arg0: i32) -> (i32, i32) {
    %c0_i32 = arith.constant 0 : i32
    %c0_i32_0 = arith.constant 0 : i32
    %c0_i32_1 = arith.constant 0 : i32
    return %c0_i32, %c0_i32_0 : i32, i32
  }
  func.func @transform_5(%arg0: i32) -> (i32, i32) {
    %c0_i32 = arith.constant 0 : i32
    %c0_i32_0 = arith.constant 0 : i32
    %c0_i32_1 = arith.constant 0 : i32
    return %c0_i32, %c0_i32_0 : i32, i32
  }
  func.func @transform_6(%arg0: i32) -> (i32, i32) {
    %c0_i32 = arith.constant 0 : i32
    %c0_i32_0 = arith.constant 0 : i32
    %c0_i32_1 = arith.constant 0 : i32
    return %c0_i32, %c0_i32_0 : i32, i32
  }
  func.func @transform_7(%arg0: i32) -> (i32, i32) {
    %c0_i32 = arith.constant 0 : i32
    %c0_i32_0 = arith.constant 0 : i32
    return %arg0, %c0_i32 : i32, i32
  }
}

</mosaic_0001>

<bundles_post_ra>
// kernel: tpu_custom_call.1
= control target key start
LH: loop header
LB: loop body
LE: loop exit
PB: predicated region body
PF: predicated region fallthrough
CT: control target
= control target key end

     0   :  { %12 = vsyncpa [#allocation3], 0  ;;  %s445_s0 = inlined_call_operand.vmem [shape: f32[8,16], index: 0, kind: input, shape index: {}]   ;;  %s446_s1 = inlined_call_operand.hbm [shape: f32[16,32], index: 1, kind: input, shape index: {}]   ;;  %s447_s2 = inlined_call_operand.vmem [shape: f32[1,32], index: 2, kind: input, shape index: {}]   ;;  %s448_s3 = inlined_call_operand.vmem [shape: f32[32,32], index: 3, kind: input, shape index: {}]   ;;  %s449_s4 = inlined_call_operand.hbm [shape: f32[1,32], index: 4, kind: input, shape index: {}]   ;;  %s450_s5 = inlined_call_operand.vmem [shape: f32[32,8], index: 5, kind: input, shape index: {}]   ;;  %s451_s6 = inlined_call_operand.vmem [shape: f32[1,8], index: 6, kind: input, shape index: {}]   ;;  %s452_s7 = inlined_call_operand.hbm [shape: f32[8,8], index: 7, kind: output, shape index: {}]  }
   0x1   :  { %13 = vsyncpa [#allocation6], 0 }
   0x2   :  { %14 = vsyncpa [#allocation4], 0  ;;  %s354_s24 = smov [#allocation2]  }
   0x3   :  { %s22_s25 = sshll.u32 %s354_s24, 4  ;;  %s23_s25 = int_to_ptr.vmem [resolvable:$true] %s22_s25 }
   0x4   :  { %s296_s26 = scalar_lea.vmem %s23_s25, 256  ;;  %p301_p1 = scmp.lt.s32.totalorder %s23_s25, %s23_s25 }
   0x5   :  { %p297_p0 = scmp.ne.s32.totalorder %s23_s25, %s296_s26  ;;  %p302_p2 = scmp.lt.s32.totalorder %s296_s26, %s296_s26 }
   0x7   :  { %p303_p3 = por %p302_p2, %p301_p1 }
   0x9   :  { %p304_p4 = pnand %p303_p3, %p297_p0 }
   0xb   :  { %307 = shalt.err (!%p304_p4)
}
   0xc   :  { %s355_s27 = smov 128   ;;  %s356_s28 = smov 8  }
   0xd   :  { %28 = dma.hbm_to_vmem [thread:$0]  %s446_s1, 256, %s23_s25, [#allocation3], %s355_s27, %s355_s27, %s356_s28  }
   0xe   :  { %s357_s8 = smov [#allocation5]  }
   0xf   :  { %s39_s9 = sshll.u32 %s357_s8, 4  ;;  %s40_s9 = int_to_ptr.vmem [resolvable:$true] %s39_s9 }
  0x10   :  { %s316_s10 = scalar_lea.vmem %s40_s9, 16  ;;  %s320_s11 = scalar_lea.vmem %s40_s9, 32 }
  0x11   :  { %p317_p5 = scmp.ne.s32.totalorder %s40_s9, %s316_s10  ;;  %p321_p6 = scmp.lt.s32.totalorder %s40_s9, %s40_s9 }
  0x12   :  { %p322_p7 = scmp.lt.s32.totalorder %s320_s11, %s316_s10 }
  0x14   :  { %p323_p8 = por %p322_p7, %p321_p6 }
  0x16   :  { %p324_p9 = pnand %p323_p8, %p317_p5 }
  0x18   :  { %327 = shalt.err (!%p324_p9)
}
  0x19   :  { %42 = dma.hbm_to_vmem [thread:$0]  %s449_s4, 16, %s40_s9, [#allocation6]  }
  0x1a   :  { %348 = dma.done.wait [#allocation3], 256  }
  0x1b   :  { %349 = vsyncadd [#allocation3], 4294967040 }
  0x1c   :  { %350 = dma.done.wait [#allocation6], 16  }
  0x1d   :  { %351 = vsyncadd [#allocation6], 4294967280  ;;  %v358_v0 = vmov 0.0   ;;  %vm359_vm0 = vmmov 0   ;;  %v56_v1 = vld [vmem:[#allocation2] sm:$0xff]  ;;  %v57_v2 = vld [vmem:[#allocation2 + $0x8] sm:$0xff] }
  0x1e   :  { %259 = vmatprep.subr.bf16.mxu0 %v358_v0  ;;  %261 = vmatprep.mubr.msk.bf16.mxu0 %vm359_vm0, %v358_v0  ;;  %v54_v3 = vld [vmem:[%s445_s0] sm:$0xff]  ;;  %v58_v4 = vpack.c.bf16 %v57_v2, %v56_v1  ;;  %vm66_vm1 = vcmask 130048   ;;  %v114_v6 = vld [vmem:[%s448_s3 + $0x10] sm:$0xff]  ;;  %v115_v7 = vld [vmem:[%s448_s3 + $0x18] sm:$0xff]  ;;  %vm125_vm2 = vcmask 261120   ;;  %s360_s8 = smov [#allocation7]  }
  0x1f   :  { %265 = vmatprep.subr.bf16.mxu1 %v358_v0  ;;  %269 = vmatprep.mubr.msk.bf16.mxu1 %vm359_vm0, %v358_v0  ;;  %v55_v5 = vpack.c.bf16 %v54_v3, %v54_v3  ;;  %v117_v8 = vpack.c.bf16 %v115_v7, %v114_v6  ;;  %v112_v9 = vld [vmem:[%s448_s3] sm:$0xff]  ;;  %v113_v10 = vld [vmem:[%s448_s3 + $0x8] sm:$0xff]  ;;  %v173_v12 = vld [vmem:[%s450_s5 + $0x10] sm:$0xff]  ;;  %s235_s9 = sshll.u32 %s360_s8, 4  ;;  %vm227_vm3 = vcmask 64512   ;;  %s236_s9 = int_to_ptr.vmem [resolvable:$true] %s235_s9 }
  0x20   :  { %260 = vmatpush3.bf16.msra.mxu0 %v58_v4  ;;  %v116_v11 = vpack.c.bf16 %v113_v10, %v112_v9  ;;  %v174_v13 = vld [vmem:[%s450_s5 + $0x18] sm:$0xff]  ;;  %v245_v15 = vld [vmem:[%s447_s2] ss:$0 sm:$0xff]  ;;  %v172_v24 = vld [vmem:[%s450_s5 + $0x8] sm:$0xff]  ;;  %p333_p11 = scmp.lt.s32.totalorder %s236_s9, %s236_s9 }
  0x21   :  { %273 = vmatprep.subr.bf16.mxu0 %v358_v0  ;;  %266 = vmatpush3.bf16.msra.mxu1 %v117_v8  ;;  %v176_v14 = vpack.c.bf16 %v174_v13, %v173_v12  ;;  %v171_v23 = vld [vmem:[%s450_s5] sm:$0xff]  ;;  %v247_v26 = vld [vmem:[#allocation5] ss:$0 sm:$0xff]  ;;  %s328_s5 = scalar_lea.vmem %s236_s9, 128 }
  0x22   :  { %267 = vmatprep.subr.bf16.mxu1 %v358_v0  ;;  %v175_v25 = vpack.c.bf16 %v172_v24, %v171_v23  ;;  %v249_v34 = vld [vmem:[%s451_s6] ss:$0 sm:$0xff]  ;;  %p329_p10 = scmp.ne.s32.totalorder %s236_s9, %s328_s5  ;;  %p334_p12 = scmp.lt.s32.totalorder %s328_s5, %s328_s5 }
  0x23   :  { %262 = vmatmul.mubr.msk.bf16.vlgmr.msra.gmra.mxu0 %vm66_vm1, %v55_v5 }
  0x24   :  { %277 = vmatprep.mubr.msk.bf16.mxu0 %vm359_vm0, %v358_v0  ;;  %274 = vmatpush3.bf16.msra.mxu0 %v176_v14  ;;  %p335_p13 = por %p334_p12, %p333_p11 }
  0x25   :  { %268 = vmatpush3.bf16.msra.mxu1 %v116_v11  ;;  %275 = vmatprep.subr.bf16.mxu0 %v358_v0 }
  0x26   :  { %p336_p0 = pnand %p335_p13, %p329_p10 }
  0x28   :  { %276 = vmatpush3.bf16.msra.mxu0 %v175_v25 }
  0xe3   :  { %v104_v16 = vpop.f32.mrf.mxu0 }
  0xe4   :  { %v105_v17 = vadd.f32 %v245_v15, %v104_v16 }
  0xe5   :  { %v263_v18 = vpop.f32.mrf.mxu0 }
  0xe6   :  { %v110_v19 = vmax.f32 %v105_v17, 0.0 }
  0xe7   :  { %v107_v20 = vpop.f32.mrf.mxu0 }
  0xe8   :  { %v111_v21 = vpack.c.bf16 %v110_v19, %v110_v19 }
  0xe9   :  { %v264_v22 = vpop.f32.mrf.mxu0 }
  0xea   :  { %270 = vmatmul.mubr.msk.bf16.vlgmr.msra.gmra.mxu1 %vm125_vm2, %v111_v21 }
 0x1aa   :  { %v163_v27 = vpop.f32.mrf.mxu1 }
 0x1ab   :  { %v164_v28 = vadd.f32 %v247_v26, %v163_v27 }
 0x1ac   :  { %v271_v29 = vpop.f32.mrf.mxu1 }
 0x1ad   :  { %v169_v30 = vmax.f32 %v164_v28, 0.0 }
 0x1ae   :  { %v166_v31 = vpop.f32.mrf.mxu1 }
 0x1af   :  { %v170_v32 = vpack.c.bf16 %v169_v30, %v169_v30 }
 0x1b0   :  { %v272_v33 = vpop.f32.mrf.mxu1 }
 0x1b1   :  { %278 = vmatmul.mubr.msk.bf16.vlgmr.msra.gmra.mxu0 %vm125_vm2, %v170_v32 }
 0x271   :  { %v221_v35 = vpop.f32.mrf.mxu0 }
 0x272   :  { %v222_v36 = vadd.f32 %v249_v34, %v221_v35 }
 0x273   :  { %v279_v37 = vpop.f32.mrf.mxu0 }
 0x274   :  { %228 = vst.msk [vmem:[#allocation7] sm:$0xff] %vm227_vm3, %v222_v36 }
 0x275   :  { %v224_v38 = vpop.f32.mrf.mxu0 }
 0x276   :  { %339 = shalt.err (!%p336_p0)
}
 0x277   :  { %238 = dma.vmem_to_hbm [thread:$0]  %s236_s9, 128, %s452_s7, [#allocation4]   ;;  %v280_v39 = vpop.f32.mrf.mxu0 }
 0x278   :  { %352 = dma.done.wait [#allocation4], 128  }
 0x279   :  { %353 = vsyncadd [#allocation4], 4294967168 }
 0x27a   :  { %242 = vsyncpa [#allocation3], 1 }
 0x27b   :  { %243 = vsyncpa [#allocation6], 1 }
 0x27c   :  { %244 = vsyncpa [#allocation4], 1 }

</bundles_post_ra>
